<compile_context>
chip_gen: v7x
topology: tpu7x:2x2x1
jax: 0.10.0
libtpu: 0.0.40
codegen_flags: <defaults>
</compile_context>

<pallas_src>
import jax
import jax.numpy as jnp
from jax.experimental import pallas as pl
from jax.experimental.pallas import tpu as pltpu

_LANE = 128  # TPU vreg lane width


def _sentiment_kernel(x_ref, w1_ref, b1_ref, w2_ref, b2_ref, o_ref):
    # fc1: (B, F) @ (F, H) + (1, H), f32 accumulation on the MXU.
    h = jnp.dot(x_ref[...], w1_ref[...], preferred_element_type=jnp.float32)
    h = h + b1_ref[...]
    # ReLU (VPU, hidden under MXU slack).
    h = jnp.maximum(h, 0.0)
    # fc2: (B, H) @ (H, O_pad) + (1, O_pad).  O_pad is lane-dense (128), so the
    # final store is an unmasked full-lane vst.
    out = jnp.dot(h.astype(w2_ref.dtype), w2_ref[...],
                  preferred_element_type=jnp.float32)
    out = out + b2_ref[...]
    o_ref[...] = out.astype(o_ref.dtype)


def sentiment_nn(x, w1, b1, w2, b2, *, use_bf16_operands=False):
    """Fused MLP forward.

    x: (B, F); w1: (F, H); b1: (H,); w2: (H, O); b2: (O,).
    Returns (B, O).

    use_bf16_operands: cast x/w1/w2 to bf16 (f32 accumulate kept) — the
    recommended setting on v6e/v7x when the model is scaled beyond toy size.
    """
    B, F = x.shape
    H = w1.shape[1]
    O = w2.shape[1]

    # Lane-pad the output dimension up to a multiple of 128 so the final store
    # is unmasked / lane-dense.  Zero-padded w2 columns + zero bias columns
    # leave the first O output columns bit-identical to the unpadded compute.
    O_pad = max(_LANE, ((O + _LANE - 1) // _LANE) * _LANE)
    w2_p = jnp.zeros((H, O_pad), w2.dtype).at[:, :O].set(w2)
    b2_p = jnp.zeros((1, O_pad), jnp.float32).at[0, :O].set(b2.astype(jnp.float32))
    b1_2d = b1.reshape(1, H).astype(jnp.float32)

    if use_bf16_operands:
        x = x.astype(jnp.bfloat16)
        w1 = w1.astype(jnp.bfloat16)
        w2_p = w2_p.astype(jnp.bfloat16)

    # Problem is tiny (~300 KB total): no grid, whole arrays resident in VMEM,
    # single kernel invocation, no pipeline/double-buffer overhead.
    out_padded = pl.pallas_call(
        _sentiment_kernel,
        out_shape=jax.ShapeDtypeStruct((B, O_pad), jnp.float32),
        in_specs=[pl.BlockSpec(memory_space=pltpu.MemorySpace.VMEM)] * 5,
        out_specs=pl.BlockSpec(memory_space=pltpu.MemorySpace.VMEM),
    )(x, w1, b1_2d, w2_p, b2_p)

    # Slice back to the true output width in the (cheap) XLA wrapper.
    return out_padded[:, :O]


def init_params(key, input_size, hidden_size, output_size):
    """Deterministic init mirroring nn.Linear's default U(-1/sqrt(fan_in), +1/sqrt(fan_in))."""
    k1, k2, k3, k4 = jax.random.split(key, 4)
    bound1 = 1.0 / jnp.sqrt(input_size)
    bound2 = 1.0 / jnp.sqrt(hidden_size)
    w1 = jax.random.uniform(k1, (input_size, hidden_size), jnp.float32, -bound1, bound1)
    b1 = jax.random.uniform(k2, (hidden_size,), jnp.float32, -bound1, bound1)
    w2 = jax.random.uniform(k3, (hidden_size, output_size), jnp.float32, -bound2, bound2)
    b2 = jax.random.uniform(k4, (output_size,), jnp.float32, -bound2, bound2)
    return w1, b1, w2, b2


if __name__ == "__main__":
    # Small shapes consistent with the module (input_size, hidden_size, output_size).
    batch = 8
    input_size = 256
    hidden_size = 128
    output_size = 3

    key = jax.random.PRNGKey(0)
    kx, kp = jax.random.split(key)
    x = jax.random.normal(kx, (batch, input_size), jnp.float32)
    w1, b1, w2, b2 = init_params(kp, input_size, hidden_size, output_size)

    out = sentiment_nn(x, w1, b1, w2, b2)
    out = jax.block_until_ready(out)

    # Cross-check against plain-JAX reference of the PyTorch forward.
    ref = jnp.maximum(x @ w1 + b1, 0.0) @ w2 + b2
    assert out.shape == (batch, output_size)
    assert jnp.allclose(out, ref, atol=1e-4, rtol=1e-4)

    print("KERNEL_OK")
</pallas_src>

<mosaic_0001>
module attributes {stable_mosaic.version = 11 : i64} {
  func.func @_sentiment_kernel(%arg0: memref<8x256xf32, #tpu.memory_space<vmem>>, %arg1: memref<256x128xf32, #tpu.memory_space<vmem>>, %arg2: memref<1x128xf32, #tpu.memory_space<vmem>>, %arg3: memref<128x128xf32, #tpu.memory_space<vmem>>, %arg4: memref<1x128xf32, #tpu.memory_space<vmem>>, %arg5: memref<8x128xf32, #tpu.memory_space<vmem>>) attributes {dimension_semantics = [], scalar_prefetch = 0 : i64, scratch_operands = 0 : i64, tpu.core_type = #tpu.core_type<tc>} {
    %c0 = arith.constant 0 : index
    %c0_0 = arith.constant 0 : index
    %0 = vector.load %arg0[%c0, %c0_0] : memref<8x256xf32, #tpu.memory_space<vmem>>, vector<8x256xf32>
    %c0_1 = arith.constant 0 : index
    %c0_2 = arith.constant 0 : index
    %1 = vector.load %arg1[%c0_1, %c0_2] : memref<256x128xf32, #tpu.memory_space<vmem>>, vector<256x128xf32>
    %cst = arith.constant dense<0.000000e+00> : vector<8x128xf32>
    %2 = tpu.matmul %0, %1, %cst {dimension_numbers = #tpu.dot_dimension_numbers<[1], [0], [0], [1], [0, 0, 1, 1], [], []>} : vector<8x256xf32>, vector<256x128xf32>, vector<8x128xf32> -> vector<8x128xf32>
    %c0_3 = arith.constant 0 : index
    %c0_4 = arith.constant 0 : index
    %3 = vector.load %arg2[%c0_3, %c0_4] : memref<1x128xf32, #tpu.memory_space<vmem>>, vector<1x128xf32>
    %4 = vector.broadcast %3 : vector<1x128xf32> to vector<8x128xf32>
    %5 = arith.addf %2, %4 : vector<8x128xf32>
    %cst_5 = arith.constant 0.000000e+00 : f32
    %6 = vector.broadcast %cst_5 : f32 to vector<8x128xf32>
    %7 = arith.maximumf %5, %6 : vector<8x128xf32>
    %c0_6 = arith.constant 0 : index
    %c0_7 = arith.constant 0 : index
    %8 = vector.load %arg3[%c0_6, %c0_7] : memref<128x128xf32, #tpu.memory_space<vmem>>, vector<128x128xf32>
    %cst_8 = arith.constant dense<0.000000e+00> : vector<8x128xf32>
    %9 = tpu.matmul %7, %8, %cst_8 {dimension_numbers = #tpu.dot_dimension_numbers<[1], [0], [0], [1], [0, 0, 1, 1], [], []>} : vector<8x128xf32>, vector<128x128xf32>, vector<8x128xf32> -> vector<8x128xf32>
    %c0_9 = arith.constant 0 : index
    %c0_10 = arith.constant 0 : index
    %10 = vector.load %arg4[%c0_9, %c0_10] : memref<1x128xf32, #tpu.memory_space<vmem>>, vector<1x128xf32>
    %11 = vector.broadcast %10 : vector<1x128xf32> to vector<8x128xf32>
    %12 = arith.addf %9, %11 : vector<8x128xf32>
    %c0_11 = arith.constant 0 : index
    %c0_12 = arith.constant 0 : index
    %13 = vector.load %arg5[%c0_11, %c0_12] : memref<8x128xf32, #tpu.memory_space<vmem>>, vector<8x128xf32>
    tpu.vector_store %arg5[%c0_11, %c0_12], %12 {strides = array<i32>} : memref<8x128xf32, #tpu.memory_space<vmem>>, vector<8x128xf32>,
    return
  }
}

</mosaic_0001>

<bundles_post_ra>
// kernel: tpu_custom_call.1
= control target key start
LH: loop header
LB: loop body
LE: loop exit
PB: predicated region body
PF: predicated region fallthrough
CT: control target
= control target key end

     0   :  { %10 = vsyncpa [#allocation3], 0  ;;  %s637_s0 = inlined_call_operand.hbm [shape: f32[8,256], index: 0, kind: input, shape index: {}]   ;;  %s638_s1 = inlined_call_operand.hbm [shape: f32[256,128], index: 1, kind: input, shape index: {}]   ;;  %s639_s2 = inlined_call_operand.vmem [shape: f32[1,128], index: 2, kind: input, shape index: {}]   ;;  %s640_s3 = inlined_call_operand.hbm [shape: f32[128,128], index: 3, kind: input, shape index: {}]   ;;  %s641_s4 = inlined_call_operand.vmem [shape: f32[1,128], index: 4, kind: input, shape index: {}]   ;;  %s642_s5 = inlined_call_operand.hbm [shape: f32[8,128], index: 5, kind: output, shape index: {}]  }
   0x1   :  { %11 = vsyncpa [#allocation6], 0 }
   0x2   :  { %12 = vsyncpa [#allocation4], 0  ;;  %s530_s18 = smov [#allocation5]   ;;  %s436_s22 = scalar_lea.hbm %s638_s1, 4096 }
   0x3   :  { %s28_s19 = sshll.u32 %s530_s18, 4  ;;  %p437_p0 = scmp.ne.s32.totalorder %s638_s1, %s436_s22  ;;  %s29_s19 = int_to_ptr.vmem [resolvable:$true] %s28_s19 }
   0x4   :  { %p440_p1 = scmp.lt.u32.totalorder %s436_s22, %s638_s1 }
   0x6   :  { %p442_p2 = pnand %p440_p1, %p437_p0 }
   0x8   :  { %445 = shalt.err (!%p442_p2)
}
   0x9   :  { %s446_s27 = scalar_lea.vmem %s29_s19, 4096  ;;  %p451_p4 = scmp.lt.s32.totalorder %s29_s19, %s29_s19 }
   0xa   :  { %p447_p3 = scmp.ne.s32.totalorder %s29_s19, %s446_s27  ;;  %p452_p5 = scmp.lt.s32.totalorder %s446_s27, %s446_s27 }
   0xc   :  { %p453_p6 = por %p452_p5, %p451_p4 }
   0xe   :  { %p454_p7 = pnand %p453_p6, %p447_p3 }
  0x10   :  { %457 = shalt.err (!%p454_p7)
}
  0x11   :  { %s531_s28 = smov 128   ;;  %s532_s29 = smov 8  }
  0x12   :  { %34 = dma.hbm_to_vmem [thread:$0]  %s638_s1, 4096, %s29_s19, [#allocation6], %s531_s28, %s531_s28, %s532_s29  }
  0x13   :  { %s533_s7 = smov [#allocation2]   ;;  %s534_s9 = smov [#allocation7]  }
  0x14   :  { %s19_s8 = sshll.u32 %s533_s7, 4  ;;  %s42_s10 = sshll.u32 %s534_s9, 4  ;;  %s20_s8 = int_to_ptr.vmem [resolvable:$true] %s19_s8  ;;  %s43_s10 = int_to_ptr.vmem [resolvable:$true] %s42_s10 }
  0x15   :  { %s458_s13 = scalar_lea.hbm %s637_s0, 256 }
  0x16   :  { %p459_p8 = scmp.ne.s32.totalorder %s637_s0, %s458_s13  ;;  %p462_p9 = scmp.lt.u32.totalorder %s458_s13, %s637_s0 }
  0x18   :  { %p464_p10 = pnand %p462_p9, %p459_p8 }
  0x1a   :  { %467 = shalt.err (!%p464_p10)
}
  0x1b   :  { %s468_s1 = scalar_lea.vmem %s20_s8, 256  ;;  %p473_p12 = scmp.lt.s32.totalorder %s20_s8, %s20_s8 }
  0x1c   :  { %p469_p11 = scmp.ne.s32.totalorder %s20_s8, %s468_s1  ;;  %p474_p13 = scmp.lt.s32.totalorder %s468_s1, %s468_s1 }
  0x1e   :  { %p475_p0 = por %p474_p13, %p473_p12 }
  0x20   :  { %p476_p1 = pnand %p475_p0, %p469_p11 }
  0x22   :  { %479 = shalt.err (!%p476_p1)
}
  0x23   :  { %22 = dma.hbm_to_vmem [thread:$0]  %s637_s0, 256, %s20_s8, [#allocation3]  }
  0x24   :  { %s480_s22 = scalar_lea.hbm %s640_s3, 2048 }
  0x25   :  { %p481_p2 = scmp.ne.s32.totalorder %s640_s3, %s480_s22  ;;  %p484_p3 = scmp.lt.u32.totalorder %s480_s22, %s640_s3 }
  0x27   :  { %p486_p4 = pnand %p484_p3, %p481_p2 }
  0x29   :  { %489 = shalt.err (!%p486_p4)
}
  0x2a   :  { %s490_s27 = scalar_lea.vmem %s43_s10, 2048  ;;  %p495_p6 = scmp.lt.s32.totalorder %s43_s10, %s43_s10 }
  0x2b   :  { %p491_p5 = scmp.ne.s32.totalorder %s43_s10, %s490_s27  ;;  %p496_p7 = scmp.lt.s32.totalorder %s490_s27, %s490_s27 }
  0x2d   :  { %p497_p8 = por %p496_p7, %p495_p6 }
  0x2f   :  { %p498_p9 = pnand %p497_p8, %p491_p5 }
  0x31   :  { %501 = shalt.err (!%p498_p9)
}
  0x32   :  { %48 = dma.hbm_to_vmem [thread:$0]  %s640_s3, 2048, %s43_s10, [#allocation6], %s531_s28, %s531_s28, %s532_s29  }
  0x33   :  { %524 = dma.done.wait [#allocation3], 256  }
  0x34   :  { %525 = vsyncadd [#allocation3], 4294967040 }
  0x35   :  { %526 = dma.done.wait [#allocation6], 6144  }
  0x36   :  { %527 = vsyncadd [#allocation6], 4294961152  ;;  %v535_v0 = vmov 0.0|0.0   ;;  %v78_v1 = vld [vmem:[#allocation5 + $0x80] sm:$0xff]  ;;  %v79_v2 = vld [vmem:[#allocation5 + $0x88] sm:$0xff]  ;;  %vm536_vm0 = vmmov 0  }
  0x37   :  { %403 = vmatprep.subr.bf16.mxu1 %v535_v0  ;;  %v62_v3 = vld [vmem:[#allocation5] sm:$0xff]  ;;  %v371_v4 = vpack.c.bf16 %v79_v2, %v78_v1  ;;  %v63_v5 = vld [vmem:[#allocation5 + $0x8] sm:$0xff]  ;;  %v80_v6 = vld [vmem:[#allocation5 + $0x90] sm:$0xff]  ;;  %s538_s7 = smov [#allocation8]  }
  0x38   :  { %v81_v7 = vld [vmem:[#allocation5 + $0x98] sm:$0xff]  ;;  %v373_v8 = vpack.c.bf16 %v63_v5, %v62_v3  ;;  %v64_v10 = vld [vmem:[#allocation5 + $0x10] sm:$0xff]  ;;  %v82_v12 = vld [vmem:[#allocation5 + $0xa0] sm:$0xff]  ;;  %s272_s8 = sshll.u32 %s538_s7, 4  ;;  %s273_s8 = int_to_ptr.vmem [resolvable:$true] %s272_s8 }
  0x39   :  { %v375_v9 = vpack.c.bf16 %v81_v7, %v80_v6  ;;  %v65_v11 = vld [vmem:[#allocation5 + $0x18] sm:$0xff]  ;;  %372 = vmatprep.subr.bf16.mxu0 %v371_v4  ;;  %v83_v13 = vld [vmem:[#allocation5 + $0xa8] sm:$0xff]  ;;  %v66_v16 = vld [vmem:[#allocation5 + $0x20] sm:$0xff]  ;;  %s502_s9 = scalar_lea.vmem %s273_s8, 128  ;;  %p507_p11 = scmp.lt.s32.totalorder %s273_s8, %s273_s8 }
  0x3a   :  { %374 = vmatpush3.bf16.msra.mxu0 %v373_v8  ;;  %v377_v14 = vpack.c.bf16 %v65_v11, %v64_v10  ;;  %v379_v15 = vpack.c.bf16 %v83_v13, %v82_v12  ;;  %v67_v17 = vld [vmem:[#allocation5 + $0x28] sm:$0xff]  ;;  %v84_v18 = vld [vmem:[#allocation5 + $0xb0] sm:$0xff]  ;;  %v85_v19 = vld [vmem:[#allocation5 + $0xb8] sm:$0xff]  ;;  %v537_v12 = vmov 0.0   ;;  %p503_p10 = scmp.ne.s32.totalorder %s273_s8, %s502_s9  ;;  %p508_p12 = scmp.lt.s32.totalorder %s502_s9, %s502_s9 }
  0x3b   :  { %376 = vmatprep.subr.bf16.mxu0 %v375_v9  ;;  %v381_v20 = vpack.c.bf16 %v67_v17, %v66_v16  ;;  %v383_v21 = vpack.c.bf16 %v85_v19, %v84_v18  ;;  %v68_v22 = vld [vmem:[#allocation5 + $0x30] sm:$0xff]  ;;  %v69_v23 = vld [vmem:[#allocation5 + $0x38] sm:$0xff]  ;;  %v86_v24 = vld [vmem:[#allocation5 + $0xc0] sm:$0xff]  ;;  %368 = vmatprep.mubr.msk.f32.mxu1 %vm536_vm0, %v537_v12 }
  0x3c   :  { %v87_v25 = vld [vmem:[#allocation5 + $0xc8] sm:$0xff]  ;;  %v61_v26 = vld [vmem:[#allocation2 + $0x8] sm:$0xff]  ;;  %v172_v27 = vld [vmem:[#allocation7] sm:$0xff]  ;;  %v385_v29 = vpack.c.bf16 %v69_v23, %v68_v22  ;;  %p509_p13 = por %p508_p12, %p507_p11 }
  0x3d   :  { %165 = vmatprep.mubr.f32.mxu0 %v61_v26  ;;  %v173_v28 = vld [vmem:[#allocation7 + $0x8] sm:$0xff]  ;;  %v174_v31 = vld [vmem:[#allocation7 + $0x10] sm:$0xff]  ;;  %v175_v32 = vld [vmem:[#allocation7 + $0x18] sm:$0xff]  ;;  %v387_v33 = vpack.c.bf16 %v87_v25, %v86_v24 }
  0x3e   :  { %378 = vmatpush3.bf16.msra.mxu0 %v377_v14  ;;  %v404_v30 = vpack.c.bf16 %v173_v28, %v172_v27  ;;  %v70_v34 = vld [vmem:[#allocation5 + $0x40] sm:$0xff]  ;;  %v71_v35 = vld [vmem:[#allocation5 + $0x48] sm:$0xff]  ;;  %v88_v36 = vld [vmem:[#allocation5 + $0xd0] sm:$0xff]  ;;  %v407_v38 = vpack.c.bf16 %v175_v32, %v174_v31  ;;  %p510_p0 = pnand %p509_p13, %p503_p10 }
  0x3f   :  { %380 = vmatprep.subr.bf16.mxu0 %v379_v15  ;;  %v89_v37 = vld [vmem:[#allocation5 + $0xd8] sm:$0xff]  ;;  %v176_v39 = vld [vmem:[#allocation7 + $0x20] sm:$0xff]  ;;  %v177_v40 = vld [vmem:[#allocation7 + $0x28] sm:$0xff]  ;;  %v389_v41 = vpack.c.bf16 %v71_v35, %v70_v34 }
  0x40   :  { %405 = vmatpush3.bf16.msra.mxu1 %v404_v30  ;;  %v391_v42 = vpack.c.bf16 %v89_v37, %v88_v36  ;;  %v72_v43 = vld [vmem:[#allocation5 + $0x50] sm:$0xff]  ;;  %v73_v44 = vld [vmem:[#allocation5 + $0x58] sm:$0xff]  ;;  %v90_v45 = vld [vmem:[#allocation5 + $0xe0] sm:$0xff]  ;;  %v410_v47 = vpack.c.bf16 %v177_v40, %v176_v39 }
  0x41   :  { %406 = vmatprep.subr.bf16.mxu1 %v535_v0  ;;  %v91_v46 = vld [vmem:[#allocation5 + $0xe8] sm:$0xff]  ;;  %v178_v48 = vld [vmem:[#allocation7 + $0x30] sm:$0xff]  ;;  %v179_v49 = vld [vmem:[#allocation7 + $0x38] sm:$0xff]  ;;  %v393_v50 = vpack.c.bf16 %v73_v44, %v72_v43 }
  0x42   :  { %382 = vmatpush3.bf16.msra.mxu0 %v381_v20  ;;  %v395_v51 = vpack.c.bf16 %v91_v46, %v90_v45  ;;  %v74_v52 = vld [vmem:[#allocation5 + $0x60] sm:$0xff]  ;;  %v75_v53 = vld [vmem:[#allocation5 + $0x68] sm:$0xff]  ;;  %v92_v54 = vld [vmem:[#allocation5 + $0xf0] sm:$0xff]  ;;  %v413_v56 = vpack.c.bf16 %v179_v49, %v178_v48 }
  0x43   :  { %384 = vmatprep.subr.bf16.mxu0 %v383_v21  ;;  %v93_v55 = vld [vmem:[#allocation5 + $0xf8] sm:$0xff]  ;;  %v180_v57 = vld [vmem:[#allocation7 + $0x40] sm:$0xff]  ;;  %v181_v58 = vld [vmem:[#allocation7 + $0x48] sm:$0xff]  ;;  %v397_v59 = vpack.c.bf16 %v75_v53, %v74_v52 }
  0x44   :  { %408 = vmatpush3.bf16.msra.mxu1 %v407_v38  ;;  %v399_v60 = vpack.c.bf16 %v93_v55, %v92_v54  ;;  %v76_v61 = vld [vmem:[#allocation5 + $0x70] sm:$0xff]  ;;  %v77_v62 = vld [vmem:[#allocation5 + $0x78] sm:$0xff]  ;;  %v416_v63 = vpack.c.bf16 %v181_v58, %v180_v57  ;;  %v184_v6 = vld [vmem:[#allocation7 + $0x60] sm:$0xff] }
  0x45   :  { %409 = vmatprep.subr.bf16.mxu1 %v535_v0  ;;  %v182_v1 = vld [vmem:[#allocation7 + $0x50] sm:$0xff]  ;;  %v183_v2 = vld [vmem:[#allocation7 + $0x58] sm:$0xff]  ;;  %v401_v3 = vpack.c.bf16 %v77_v62, %v76_v61  ;;  %v185_v7 = vld [vmem:[#allocation7 + $0x68] sm:$0xff] }
  0x46   :  { %386 = vmatpush3.bf16.msra.mxu0 %v385_v29  ;;  %v419_v4 = vpack.c.bf16 %v183_v2, %v182_v1  ;;  %v60_v5 = vld [vmem:[#allocation2] sm:$0xff]  ;;  %v422_v8 = vpack.c.bf16 %v185_v7, %v184_v6  ;;  %v187_v10 = vld [vmem:[#allocation7 + $0x78] sm:$0xff] }
  0x47   :  { %388 = vmatprep.subr.bf16.mxu0 %v387_v33  ;;  %v186_v9 = vld [vmem:[#allocation7 + $0x70] sm:$0xff] }
  0x48   :  { %411 = vmatpush3.bf16.msra.mxu1 %v410_v47  ;;  %v425_v11 = vpack.c.bf16 %v187_v10, %v186_v9  ;;  %v282_v14 = vld [vmem:[%s639_s2] ss:$0 sm:$0xff] }
  0x49   :  { %412 = vmatprep.subr.bf16.mxu1 %v535_v0 }
  0x4a   :  { %390 = vmatpush3.bf16.msra.mxu0 %v389_v41 }
  0x4b   :  { %392 = vmatprep.subr.bf16.mxu0 %v391_v42 }
  0x4c   :  { %414 = vmatpush3.bf16.msra.mxu1 %v413_v56 }
  0x4d   :  { %415 = vmatprep.subr.bf16.mxu1 %v535_v0 }
  0x4e   :  { %394 = vmatpush3.bf16.msra.mxu0 %v393_v50 }
  0x4f   :  { %396 = vmatprep.subr.bf16.mxu0 %v395_v51 }
  0x50   :  { %417 = vmatpush3.bf16.msra.mxu1 %v416_v63 }
  0x51   :  { %418 = vmatprep.subr.bf16.mxu1 %v535_v0 }
  0x52   :  { %398 = vmatpush3.bf16.msra.mxu0 %v397_v59 }
  0x53   :  { %400 = vmatprep.subr.bf16.mxu0 %v399_v60 }
  0x54   :  { %420 = vmatpush3.bf16.msra.mxu1 %v419_v4 }
  0x55   :  { %421 = vmatprep.subr.bf16.mxu1 %v535_v0 }
  0x56   :  { %402 = vmatpush3.bf16.msra.mxu0 %v401_v3 }
  0x58   :  { %423 = vmatpush3.bf16.msra.mxu1 %v422_v8 }
  0x59   :  { %166 = vmatmul.mubr.f32.vlgmr.msra.gmra.mrb[0].mxu0 %v60_v5  ;;  %424 = vmatprep.subr.bf16.mxu1 %v535_v0  ;;  %v283_v0 = vld [vmem:[%s641_s4] ss:$0 sm:$0xff] }
  0x5c   :  { %426 = vmatpush3.bf16.msra.mxu1 %v425_v11 }
 0x12c   :  { %v316_v13 = vpop.f32.mrb[0].mxu0 }
 0x12d   :  { %v317_v15 = vpop.f32.mrb[1].mxu0 }
 0x12e   :  { %v318_v16 = vadd.f32 %v317_v15, %v316_v13 }
 0x130   :  { %v168_v17 = vadd.f32 %v318_v16, %v282_v14 }
 0x132   :  { %v171_v18 = vmax.f32 %v168_v17, 0.0 }
 0x134   :  { %369 = vmatmul.mubr.f32.vlgmr.msra.gmra.mrb[0].mxu1 %v171_v18 }
 0x207   :  { %v261_v19 = vpop.f32.mrb[0].mxu1 }
 0x208   :  { %v262_v20 = vadd.f32 %v283_v0, %v261_v19  ;;  %v370_v21 = vpop.f32.mrb[1].mxu1 }
 0x20a   :  { %265 = vst [vmem:[#allocation8] sm:$0xff] %v262_v20 }
 0x20b   :  { %513 = shalt.err (!%p510_p0)
}
 0x20c   :  { %s514_s11 = scalar_lea.hbm %s642_s5, 128 }
 0x20d   :  { %p515_p1 = scmp.ne.s32.totalorder %s642_s5, %s514_s11  ;;  %p518_p2 = scmp.lt.u32.totalorder %s514_s11, %s642_s5 }
 0x20f   :  { %p520_p3 = pnand %p518_p2, %p515_p1 }
 0x211   :  { %523 = shalt.err (!%p520_p3)
}
 0x212   :  { %275 = dma.vmem_to_hbm [thread:$0]  %s273_s8, 128, %s642_s5, [#allocation4]  }
 0x213   :  { %528 = dma.done.wait [#allocation4], 128  }
 0x214   :  { %529 = vsyncadd [#allocation4], 4294967168 }
 0x215   :  { %279 = vsyncpa [#allocation3], 1 }
 0x216   :  { %280 = vsyncpa [#allocation6], 1 }
 0x217   :  { %281 = vsyncpa [#allocation4], 1 }

</bundles_post_ra>
